<compile_context>
chip_gen: v7x
topology: tpu7x:2x2x1
jax: 0.10.0
libtpu: 0.0.40
codegen_flags: <defaults>
</compile_context>

<pallas_src>
import jax
import jax.numpy as jnp
from jax import lax
from jax.experimental import pallas as pl
from jax.experimental.pallas import tpu as pltpu

HIDDEN = 128
NOUT = 2


def reinforce_kernel(x_ref, w1_ref, b1_ref, w2d_ref, b2d_ref, o_ref):
    # x_ref:   (tb, 4)       w1_ref:  (4, 128)     b1_ref: (1, 128)
    # w2d_ref: (1, 128)  (= w2[:,0]-w2[:,1])       b2d_ref: (1, 1)
    # o_ref:   (tb, 2)   -> [p(action 0), p(action 1)]
    x = x_ref[...]

    # layer 1 + ReLU (MXU matmul, f32 accumulation)
    h = jnp.dot(x, w1_ref[...], preferred_element_type=jnp.float32) + b1_ref[...]
    h = jnp.maximum(h, 0.0)

    # layer 2 collapsed to the logit difference d = logit0 - logit1:
    # VPU multiply + XLU lane-reduce instead of a lane-padded 128x128 matmul.
    d = jnp.sum(h * w2d_ref[...], axis=-1, keepdims=True) + b2d_ref[...]   # (tb, 1)

    # Exact 2-class softmax: p0 = sigmoid(d), p1 = sigmoid(-d) = 1 - p0.
    lane = lax.broadcasted_iota(jnp.int32, o_ref.shape, 1)                 # (tb, 2)
    o_ref[...] = jax.nn.sigmoid(jnp.where(lane == 0, d, -d))


def prepare_params(w1, b1, w2, b2):
    """One-time parameter prep (hoisted out of the per-call hot path).

    Weights are stored (in_features, out_features).  The 2-column second layer
    is folded into a single logit-difference vector so the kernel never touches
    a lane-padded (128, 128) weight block."""
    w1p = w1.astype(jnp.float32)                                  # (4, 128)
    b1p = b1.reshape(1, HIDDEN).astype(jnp.float32)               # (1, 128)
    w2d = (w2[:, 0] - w2[:, 1]).reshape(1, HIDDEN).astype(jnp.float32)  # (1, 128)
    b2d = (b2[0] - b2[1]).reshape(1, 1).astype(jnp.float32)       # (1, 1)
    return w1p, b1p, w2d, b2d


def _block_rows(batch):
    """Batch-tile size.  For B <= 128 use one exact block (no partial blocks,
    no padding); for large rollout batches use bigger tiles to amortize the
    ~0.35us per-grid-step overhead (working set stays << VMEM on all gens)."""
    if batch <= 128:
        return batch
    if batch >= 4096:
        return 1024
    if batch >= 1024:
        return 512
    return 128


@jax.jit
def _forward_impl(xb, w1p, b1p, w2d, b2d):
    """xb: (B, 4) -> (B, 2) action probabilities."""
    batch = xb.shape[0]
    tb = _block_rows(batch)
    return pl.pallas_call(
        reinforce_kernel,
        out_shape=jax.ShapeDtypeStruct((batch, NOUT), jnp.float32),
        grid=(pl.cdiv(batch, tb),),
        in_specs=[
            pl.BlockSpec((tb, 4), lambda i: (i, 0)),          # x tile
            pl.BlockSpec((4, HIDDEN), lambda i: (0, 0)),      # W1 (VMEM-resident)
            pl.BlockSpec((1, HIDDEN), lambda i: (0, 0)),      # b1
            pl.BlockSpec((1, HIDDEN), lambda i: (0, 0)),      # w2 diff
            pl.BlockSpec((1, 1), lambda i: (0, 0)),           # b2 diff
        ],
        out_specs=pl.BlockSpec((tb, NOUT), lambda i: (i, 0)),
        compiler_params=pltpu.CompilerParams(
            dimension_semantics=("parallel",)),   # v7x: batch tiles across both TCs
    )(xb.astype(jnp.float32), w1p, b1p, w2d, b2d)


def reinforce_forward(x, w1p, b1p, w2d, b2d):
    """x: (4,) single state -> (2,) probs, or (B, 4) batch -> (B, 2) probs."""
    single = x.ndim == 1
    xb = x.reshape(1, 4) if single else x
    probs = _forward_impl(xb, w1p, b1p, w2d, b2d)
    return probs[0] if single else probs


def init_params(key):
    """nn.Linear-shaped params (weights stored transposed: (in, out));
    torch default U(-1/sqrt(fan_in), 1/sqrt(fan_in))."""
    k1, k2, k3, k4 = jax.random.split(key, 4)
    lim1 = 1.0 / jnp.sqrt(4.0)
    lim2 = 1.0 / jnp.sqrt(128.0)
    w1 = jax.random.uniform(k1, (4, HIDDEN), jnp.float32, -lim1, lim1)
    b1 = jax.random.uniform(k2, (HIDDEN,), jnp.float32, -lim1, lim1)
    w2 = jax.random.uniform(k3, (HIDDEN, NOUT), jnp.float32, -lim2, lim2)
    b2 = jax.random.uniform(k4, (NOUT,), jnp.float32, -lim2, lim2)
    return w1, b1, w2, b2


def reference_forward(xb, w1, b1, w2, b2):
    h = jnp.maximum(xb @ w1 + b1, 0.0)
    logits = h @ w2 + b2
    return jax.nn.softmax(logits, axis=-1)


# TODO(synk): training-side pieces (Categorical sampling, REINFORCE loss/optim)
# are host/autodiff logic outside this forward kernel.

if __name__ == "__main__":
    key = jax.random.PRNGKey(0)
    kp, kx = jax.random.split(key)
    w1, b1, w2, b2 = init_params(kp)
    w1p, b1p, w2d, b2d = prepare_params(w1, b1, w2, b2)

    # Small batch of CartPole observations: (8, 4)
    xb = jax.random.normal(kx, (8, 4), dtype=jnp.float32)

    # Batched path
    probs = jax.block_until_ready(reinforce_forward(xb, w1p, b1p, w2d, b2d))
    ref = reference_forward(xb, w1, b1, w2, b2)
    assert probs.shape == (8, 2)
    assert jnp.allclose(probs, ref, atol=1e-5), (probs, ref)
    assert jnp.allclose(jnp.sum(probs, axis=-1), 1.0, atol=1e-5)

    # Non-8-aligned batch (block == full batch, still no padding needed)
    xb5 = xb[:5]
    probs5 = jax.block_until_ready(reinforce_forward(xb5, w1p, b1p, w2d, b2d))
    assert probs5.shape == (5, 2)
    assert jnp.allclose(probs5, ref[:5], atol=1e-5)

    # Single-state path (the original module signature: x of shape (4,))
    x1 = xb[0]
    p1 = jax.block_until_ready(reinforce_forward(x1, w1p, b1p, w2d, b2d))
    ref1 = jax.nn.softmax(jnp.maximum(x1 @ w1 + b1, 0.0) @ w2 + b2, axis=0)
    assert p1.shape == (2,)
    assert jnp.allclose(p1, ref1, atol=1e-5), (p1, ref1)

    print("KERNEL_OK")
</pallas_src>

<mosaic_0001>
module attributes {stable_mosaic.version = 11 : i64} {
  func.func @reinforce_kernel(%arg0: i32, %arg1: memref<8x4xf32, #tpu.memory_space<vmem>>, %arg2: memref<4x128xf32, #tpu.memory_space<vmem>>, %arg3: memref<1x128xf32, #tpu.memory_space<vmem>>, %arg4: memref<1x128xf32, #tpu.memory_space<vmem>>, %arg5: memref<1x1xf32, #tpu.memory_space<vmem>>, %arg6: memref<8x2xf32, #tpu.memory_space<vmem>>) attributes {dimension_semantics = [#tpu.dimension_semantics<parallel>], iteration_bounds = array<i64: 1>, scalar_prefetch = 0 : i64, scratch_operands = 0 : i64, tpu.core_type = #tpu.core_type<tc>, window_params = [{transform_indices = @transform_0, window_bounds = array<i64: 8, 4>}, {pipeline_mode = #tpu.pipeline_mode<synchronous>, transform_indices = @transform_1, window_bounds = array<i64: 4, 128>}, {pipeline_mode = #tpu.pipeline_mode<synchronous>, transform_indices = @transform_2, window_bounds = array<i64: 1, 128>}, {pipeline_mode = #tpu.pipeline_mode<synchronous>, transform_indices = @transform_3, window_bounds = array<i64: 1, 128>}, {pipeline_mode = #tpu.pipeline_mode<synchronous>, transform_indices = @transform_4, window_bounds = array<i64: 1, 1>}, {transform_indices = @transform_5, window_bounds = array<i64: 8, 2>}]} {
    %c0 = arith.constant 0 : index
    %c0_0 = arith.constant 0 : index
    %0 = vector.load %arg1[%c0, %c0_0] : memref<8x4xf32, #tpu.memory_space<vmem>>, vector<8x4xf32>
    %c0_1 = arith.constant 0 : index
    %c0_2 = arith.constant 0 : index
    %1 = vector.load %arg2[%c0_1, %c0_2] : memref<4x128xf32, #tpu.memory_space<vmem>>, vector<4x128xf32>
    %cst = arith.constant dense<0.000000e+00> : vector<8x128xf32>
    %2 = tpu.matmul %0, %1, %cst {dimension_numbers = #tpu.dot_dimension_numbers<[1], [0], [0], [1], [0, 0, 1, 1], [], []>} : vector<8x4xf32>, vector<4x128xf32>, vector<8x128xf32> -> vector<8x128xf32>
    %c0_3 = arith.constant 0 : index
    %c0_4 = arith.constant 0 : index
    %3 = vector.load %arg3[%c0_3, %c0_4] : memref<1x128xf32, #tpu.memory_space<vmem>>, vector<1x128xf32>
    %4 = vector.broadcast %3 : vector<1x128xf32> to vector<8x128xf32>
    %5 = arith.addf %2, %4 : vector<8x128xf32>
    %cst_5 = arith.constant 0.000000e+00 : f32
    %6 = vector.broadcast %cst_5 : f32 to vector<8x128xf32>
    %7 = arith.maximumf %5, %6 : vector<8x128xf32>
    %c0_6 = arith.constant 0 : index
    %c0_7 = arith.constant 0 : index
    %8 = vector.load %arg4[%c0_6, %c0_7] : memref<1x128xf32, #tpu.memory_space<vmem>>, vector<1x128xf32>
    %9 = vector.broadcast %8 : vector<1x128xf32> to vector<8x128xf32>
    %10 = arith.mulf %7, %9 : vector<8x128xf32>
    %cst_8 = arith.constant dense<0.000000e+00> : vector<8xf32>
    %11 = vector.multi_reduction <add>, %10, %cst_8 [1] : vector<8x128xf32> to vector<8xf32>
    %12 = vector.shape_cast %11 : vector<8xf32> to vector<8x1xf32>
    %c0_9 = arith.constant 0 : index
    %c0_10 = arith.constant 0 : index
    %13 = vector.load %arg5[%c0_9, %c0_10] : memref<1x1xf32, #tpu.memory_space<vmem>>, vector<1x1xf32>
    %14 = vector.broadcast %13 : vector<1x1xf32> to vector<8x1xf32>
    %15 = arith.addf %12, %14 : vector<8x1xf32>
    %16 = tpu.iota {dimensions = array<i32: 1>} : vector<8x2xi32>
    %c0_i32 = arith.constant 0 : i32
    %17 = vector.broadcast %c0_i32 : i32 to vector<8x2xi32>
    %18 = arith.cmpi eq, %16, %17 : vector<8x2xi32>
    %cst_11 = arith.constant 0.000000e+00 : f32
    %19 = vector.broadcast %cst_11 : f32 to vector<8x1xf32>
    %20 = arith.subf %19, %15 : vector<8x1xf32>
    %21 = vector.shape_cast %15 : vector<8x1xf32> to vector<8x1xf32>
    %22 = vector.broadcast %21 : vector<8x1xf32> to vector<8x2xf32>
    %23 = vector.shape_cast %20 : vector<8x1xf32> to vector<8x1xf32>
    %24 = vector.broadcast %23 : vector<8x1xf32> to vector<8x2xf32>
    %25 = arith.select %18, %22, %24 : vector<8x2xi1>, vector<8x2xf32>
    %26 = arith.negf %25 : vector<8x2xf32>
    %27 = math.exp %26 : vector<8x2xf32>
    %cst_12 = arith.constant 1.000000e+00 : f32
    %28 = vector.broadcast %cst_12 : f32 to vector<8x2xf32>
    %29 = arith.addf %28, %27 : vector<8x2xf32>
    %30 = arith.divf %28, %29 : vector<8x2xf32>
    %c0_13 = arith.constant 0 : index
    %c0_14 = arith.constant 0 : index
    %31 = vector.load %arg6[%c0_13, %c0_14] : memref<8x2xf32, #tpu.memory_space<vmem>>, vector<8x2xf32>
    tpu.vector_store %arg6[%c0_13, %c0_14], %30 {strides = array<i32>} : memref<8x2xf32, #tpu.memory_space<vmem>>, vector<8x2xf32>,
    return
  }
  func.func @transform_0(%arg0: i32) -> (i32, i32) {
    %c0_i32 = arith.constant 0 : i32
    %c0_i32_0 = arith.constant 0 : i32
    return %arg0, %c0_i32 : i32, i32
  }
  func.func @transform_1(%arg0: i32) -> (i32, i32) {
    %c0_i32 = arith.constant 0 : i32
    %c0_i32_0 = arith.constant 0 : i32
    %c0_i32_1 = arith.constant 0 : i32
    return %c0_i32, %c0_i32_0 : i32, i32
  }
  func.func @transform_2(%arg0: i32) -> (i32, i32) {
    %c0_i32 = arith.constant 0 : i32
    %c0_i32_0 = arith.constant 0 : i32
    %c0_i32_1 = arith.constant 0 : i32
    return %c0_i32, %c0_i32_0 : i32, i32
  }
  func.func @transform_3(%arg0: i32) -> (i32, i32) {
    %c0_i32 = arith.constant 0 : i32
    %c0_i32_0 = arith.constant 0 : i32
    %c0_i32_1 = arith.constant 0 : i32
    return %c0_i32, %c0_i32_0 : i32, i32
  }
  func.func @transform_4(%arg0: i32) -> (i32, i32) {
    %c0_i32 = arith.constant 0 : i32
    %c0_i32_0 = arith.constant 0 : i32
    %c0_i32_1 = arith.constant 0 : i32
    return %c0_i32, %c0_i32_0 : i32, i32
  }
  func.func @transform_5(%arg0: i32) -> (i32, i32) {
    %c0_i32 = arith.constant 0 : i32
    %c0_i32_0 = arith.constant 0 : i32
    return %arg0, %c0_i32 : i32, i32
  }
}

</mosaic_0001>

<bundles_post_ra>
// kernel: _forward_impl.1
= control target key start
LH: loop header
LB: loop body
LE: loop exit
PB: predicated region body
PF: predicated region fallthrough
CT: control target
= control target key end

     0   :  { %vm35_vm0 = vcmask 1043456   ;;  %vm31_vm1 = vcmask 31744   ;;  %v177_v0 = vmov 0.0   ;;  %vm178_vm2 = vmmov 0   ;;  %s228_s1 = inlined_call_operand.vmem [shape: f32[4,128], index: 1, kind: input, shape index: {}]   ;;  %s229_s0 = inlined_call_operand.vmem [shape: f32[8,4], index: 0, kind: input, shape index: {}]   ;;  %s230_s4 = inlined_call_operand.<no memory space> [shape: f32[1,1], index: 4, kind: input, shape index: {}]   ;;  %s231_s2 = inlined_call_operand.vmem [shape: f32[1,128], index: 2, kind: input, shape index: {}]   ;;  %s232_s3 = inlined_call_operand.vmem [shape: f32[1,128], index: 3, kind: input, shape index: {}]   ;;  %s233_s5 = inlined_call_operand.vmem [shape: f32[8,2], index: 5, kind: output, shape index: {}]  }
   0x1   :  { %163 = vmatprep.subr.mxu0 %v177_v0  ;;  %v23_v1 = vld [vmem:[%s228_s1] sm:$0xf]  ;;  %165 = vmatprep.mubr.msk.f32.mxu0 %vm178_vm2, %v177_v0  ;;  %v10_v3 = vstv %s230_s4  ;;  %v179_v11 = vmov 0   ;;  %v128_v16 = vlaneseq  ;;  %vm149_vm4 = vcmask 15360  }
   0x2   :  { %v22_v2 = vld [vmem:[%s229_s0] sm:$0xff]  ;;  %164 = vmatpush3.msk.msra.mxu0 %vm35_vm0, %v23_v1  ;;  %11 = vst [vmem:[#allocation2] sm:$0x1] %v10_v3  ;;  %171 = vset.pattern.permute.xlu0 %v179_v11 }
   0x3   :  { %166 = vmatmul.mubr.msk.f32.vlgmr.msra.gmra.mrb[0].mxu0 %vm31_vm1, %v22_v2  ;;  %v155_v4 = vld [vmem:[%s231_s2] ss:$0 sm:$0xff]  ;;  %172 = vset.pattern.permute.xlu1 %v179_v11  ;;  %v129_v17 = vand.u32 127, %v128_v16 }
   0x4   :  { %v158_v8 = vld [vmem:[%s232_s3] ss:$0 sm:$0xff] }
   0x5   :  { %vm130_vm3 = vcmp.eq.s32.totalorder %v129_v17, 0 }
   0x9   :  { %v159_v12 = vld [vmem:[#allocation2] ss:$0 sm:$0xff] }
  0xd6   :  { %v105_v5 = vpop.f32.mrb[0].mxu0 }
  0xd7   :  { %v106_v6 = vadd.f32 %v155_v4, %v105_v5  ;;  %v167_v7 = vpop.f32.mrb[1].mxu0 }
  0xd9   :  { %v109_v9 = vmax.f32 %v106_v6, 0.0 }
  0xdb   :  { %v117_v10 = vmul.f32 %v158_v8, %v109_v9 }
  0xdd   :  { %118 = vadd.xlane.f32.xlu0 %v117_v10 }
 0x16a   :  { %v119_v13 = vpop.xlane.xlu0 %118 }
 0x16b   :  { %v127_v14 = vadd.f32 %v159_v12, %v119_v13 }
 0x16d   :  { %134 = vperm.xlu0 %171, %v127_v14   ;;  %v131_v15 = vsub.f32 0.0, %v127_v14 }
 0x16f   :  { %139 = vperm.xlu1 %172, %v131_v15  }
 0x1ec   :  { %v135_v18 = vpop.permute.xlu0 %134 }
 0x1ee   :  { %v140_v19 = vpop.permute.xlu1 %139 }
 0x1ef   :  { %v142_v20 = vsel %vm130_vm3, %v135_v18, %v140_v19 }
 0x1f0   :  { %v160_v21 = vmul.f32 -1.442695, %v142_v20 }
 0x1f2   :  { %173 = vpow2.f32 %v160_v21 }
 0x1fc   :  { %v174_v22 = vpop.eup %173 }
 0x1fd   :  { %v146_v23 = vadd.f32 1.0, %v174_v22 }
 0x1ff   :  { %175 = vrcp.f32 %v146_v23 }
 0x209   :  { %v176_v24 = vpop.eup %175 }
 0x20a   :  { %150 = vst.msk [vmem:[%s233_s5] sm:$0xff] %vm149_vm4, %v176_v24 }

</bundles_post_ra>
